<compile_context>
chip_gen: v6e
topology: v6e:2x2x1
jax: 0.10.0
libtpu: 0.0.40
codegen_flags: <defaults>
</compile_context>

<pallas_src>
import jax
import jax.numpy as jnp
from jax.experimental import pallas as pl
from jax.experimental.pallas import tpu as pltpu


_LANE = 128
_SUBLANE_MULT = 32  # covers f32 (8) / bf16 (16) / int8 & fp8 (32) sublane packing


def _relu_kernel(x_ref, o_ref):
    # Single vmax per vreg; no materialized zero tile.
    o_ref[...] = jnp.maximum(x_ref[...], 0).astype(o_ref.dtype)


def _pick_lane(n: int):
    """Widest lane width (multiple of 128) that exactly divides n, else None."""
    for lane in (4096, 2048, 1024, 512, 256, 128):
        if n % lane == 0:
            return lane
    return None


def _round_up(x: int, m: int) -> int:
    return -(-x // m) * m


def _relu_2d(flat, n, lane, dtype):
    """Common path: free (rows, lane) view, row-blocked grid, masked row tail."""
    rows = n // lane
    x2d = flat.reshape(rows, lane)
    itemsize = jnp.dtype(dtype).itemsize

    # ~8 MiB of data per buffer (review: 4-8 MiB; top of range favours v7x's
    # higher HBM bandwidth and costs nothing on v5e/v6e).
    target_bytes = 8 << 20
    block_rows = max(
        _SUBLANE_MULT,
        (target_bytes // (lane * itemsize)) // _SUBLANE_MULT * _SUBLANE_MULT,
    )
    if block_rows >= rows:
        block_rows = rows  # full-extent block is always a legal block shape
    else:
        # Best-effort: make the block count even so both v7x TensorCores get a
        # balanced share of the "parallel" grid axis.
        nb = pl.cdiv(rows, block_rows)
        if nb % 2 == 1:
            cand = _round_up(-(-rows // (nb + 1)), _SUBLANE_MULT)
            if _SUBLANE_MULT <= cand < rows and pl.cdiv(rows, cand) % 2 == 0:
                block_rows = cand

    grid = (pl.cdiv(rows, block_rows),)  # tail block (if any) is masked by Pallas

    # Real footprint: double-buffered input + output, plus slack for compiler
    # internal scratch. Never anywhere near v7x's 64 MiB physical VMEM.
    buffer_bytes = block_rows * lane * itemsize
    vmem_limit = max(16 << 20, 4 * buffer_bytes + (8 << 20))

    out2d = pl.pallas_call(
        _relu_kernel,
        out_shape=jax.ShapeDtypeStruct((rows, lane), dtype),
        grid_spec=pltpu.PrefetchScalarGridSpec(
            num_scalar_prefetch=0,
            grid=grid,
            in_specs=[pl.BlockSpec((block_rows, lane), lambda i: (i, 0))],
            out_specs=pl.BlockSpec((block_rows, lane), lambda i: (i, 0)),
        ),
        compiler_params=pltpu.CompilerParams(
            dimension_semantics=("parallel",),
            vmem_limit_bytes=vmem_limit,
        ),
    )(x2d)
    return out2d.reshape(-1)


def _relu_flat(flat, n, dtype):
    """Ragged fallback (n not a multiple of 128): free (1, n) view, lane-blocked
    grid, Pallas-masked tail. One HBM read + one write per byte, no pad/slice."""
    block_cols = 128 * 1024  # multiple of 128; ~4 MiB VMEM/buffer after tile padding
    if block_cols >= n:
        block_cols = n  # full-extent block, always legal

    x2d = flat.reshape(1, n)
    grid = (pl.cdiv(n, block_cols),)

    # (1, N) tiles use a single useful sublane -> padded footprint ~32 B/elem.
    buffer_bytes = 32 * _round_up(block_cols, _LANE)
    vmem_limit = max(16 << 20, 4 * buffer_bytes + (8 << 20))

    out2d = pl.pallas_call(
        _relu_kernel,
        out_shape=jax.ShapeDtypeStruct((1, n), dtype),
        grid_spec=pltpu.PrefetchScalarGridSpec(
            num_scalar_prefetch=0,
            grid=grid,
            in_specs=[pl.BlockSpec((1, block_cols), lambda i: (0, i))],
            out_specs=pl.BlockSpec((1, block_cols), lambda i: (0, i)),
        ),
        compiler_params=pltpu.CompilerParams(
            dimension_semantics=("parallel",),
            vmem_limit_bytes=vmem_limit,
        ),
    )(x2d)
    return out2d.reshape(-1)


def relu_pallas(x: jax.Array, *, min_pallas_bytes: int = 512 * 1024) -> jax.Array:
    """Elementwise ReLU via a Pallas TPU kernel. Works on any shape / dtype."""
    orig_shape = x.shape
    dtype = x.dtype
    n = x.size

    # Tiny-tensor bypass: a standalone pallas_call costs a few us of launch +
    # pipeline prologue; plain maximum is faster and fusible for small inputs.
    if n == 0 or n * jnp.dtype(dtype).itemsize < min_pallas_bytes:
        return jnp.maximum(x, 0)

    flat = x.reshape(-1)  # contiguous -> free layout view
    lane = _pick_lane(n)
    if lane is None:
        out = _relu_flat(flat, n, dtype)
    else:
        out = _relu_2d(flat, n, lane, dtype)
    return out.reshape(orig_shape)


if __name__ == "__main__":
    key = jax.random.PRNGKey(0)
    k0, k1, k2 = jax.random.split(key, 3)

    # Small NCHW activation consistent with the module's forward (ReLU(x1)).
    x_small = jax.random.normal(k0, (2, 4, 16, 16), dtype=jnp.float32)
    # Force the Pallas path (below the small-input bypass threshold) so the
    # kernel itself is exercised on this shape.
    y_small = jax.block_until_ready(relu_pallas(x_small, min_pallas_bytes=0))
    assert y_small.shape == x_small.shape and y_small.dtype == x_small.dtype
    assert jnp.allclose(y_small, jnp.maximum(x_small, 0.0))

    # Multi-block common path (exercises even-grid adjustment: 3 -> 4 blocks).
    x_big = jax.random.normal(k1, (24, 256, 1024), dtype=jnp.float32)
    y_big = jax.block_until_ready(relu_pallas(x_big))
    assert jnp.allclose(y_big, jnp.maximum(x_big, 0.0))

    # Ragged fallback path (element count not a multiple of 128, masked tail).
    x_rag = jax.random.normal(k2, (5, 999, 173), dtype=jnp.float32)
    y_rag = jax.block_until_ready(relu_pallas(x_rag))
    assert jnp.allclose(y_rag, jnp.maximum(x_rag, 0.0))

    print("KERNEL_OK")
</pallas_src>

<mosaic_0001>
module attributes {stable_mosaic.version = 11 : i64} {
  func.func @_relu_kernel(%arg0: i32, %arg1: memref<1x2048xf32, #tpu.memory_space<vmem>>, %arg2: memref<1x2048xf32, #tpu.memory_space<vmem>>) attributes {dimension_semantics = [#tpu.dimension_semantics<parallel>], iteration_bounds = array<i64: 1>, scalar_prefetch = 0 : i64, scratch_operands = 0 : i64, tpu.core_type = #tpu.core_type<tc>, window_params = [{transform_indices = @transform_0, window_bounds = array<i64: 1, 2048>}, {transform_indices = @transform_1, window_bounds = array<i64: 1, 2048>}]} {
    %c0 = arith.constant 0 : index
    %c0_0 = arith.constant 0 : index
    %0 = vector.load %arg1[%c0, %c0_0] : memref<1x2048xf32, #tpu.memory_space<vmem>>, vector<1x2048xf32>
    %cst = arith.constant 0.000000e+00 : f32
    %1 = vector.broadcast %cst : f32 to vector<1x2048xf32>
    %2 = arith.maximumf %0, %1 : vector<1x2048xf32>
    %c0_1 = arith.constant 0 : index
    %c0_2 = arith.constant 0 : index
    %3 = vector.load %arg2[%c0_1, %c0_2] : memref<1x2048xf32, #tpu.memory_space<vmem>>, vector<1x2048xf32>
    tpu.vector_store %arg2[%c0_1, %c0_2], %2 {strides = array<i32>} : memref<1x2048xf32, #tpu.memory_space<vmem>>, vector<1x2048xf32>,
    return
  }
  func.func @transform_0(%arg0: i32) -> (i32, i32) {
    %c0_i32 = arith.constant 0 : i32
    %c0_i32_0 = arith.constant 0 : i32
    return %arg0, %c0_i32 : i32, i32
  }
  func.func @transform_1(%arg0: i32) -> (i32, i32) {
    %c0_i32 = arith.constant 0 : i32
    %c0_i32_0 = arith.constant 0 : i32
    return %arg0, %c0_i32 : i32, i32
  }
}

</mosaic_0001>

<bundles_post_ra>
// kernel: tpu_custom_call.1
= control target key start
LH: loop header
LB: loop body
LE: loop exit
PB: predicated region body
PF: predicated region fallthrough
CT: control target
= control target key end

     0   :  { %6 = vsyncpa [#allocation3], 0  ;;  %s106_s0 = inlined_call_operand.hbm [shape: f32[1,2048], index: 0, kind: input, shape index: {}]   ;;  %s107_s1 = inlined_call_operand.hbm [shape: f32[1,2048], index: 1, kind: output, shape index: {}]  }
   0x1   :  { %7 = vsyncpa [#allocation4], 0  ;;  %s88_s6 = smov [#allocation2]  }
   0x2   :  { %s14_s7 = sshll.u32 %s88_s6, 4  ;;  %s15_s7 = int_to_ptr.vmem [resolvable:$true] %s14_s7 }
   0x3   :  { %s52_s8 = scalar_lea.vmem %s15_s7, 256  ;;  %p57_p1 = scmp.lt.s32.totalorder %s15_s7, %s15_s7 }
   0x4   :  { %p53_p0 = scmp.ne.s32.totalorder %s15_s7, %s52_s8  ;;  %p58_p2 = scmp.lt.s32.totalorder %s52_s8, %s52_s8 }
   0x6   :  { %p59_p3 = por %p58_p2, %p57_p1 }
   0x8   :  { %p60_p4 = pnand %p59_p3, %p53_p0 }
   0xa   :  { %63 = shalt.err (!%p60_p4)
}
   0xb   :  { %17 = dma.hbm_to_vmem [thread:$0]  %s106_s0, 256, %s15_s7, [#allocation3]  }
   0xc   :  { %84 = dma.done.wait [#allocation3], 256  }
   0xd   :  { %85 = vsyncadd [#allocation3], 4294967040  ;;  %s89_s11 = smov [#allocation5]   ;;  %v21_v0 = vld [vmem:[#allocation2] sm:$0xff]  ;;  %v22_v1 = vld [vmem:[#allocation2 + $0x8] sm:$0xff] }
   0xe   :  { %s33_s12 = sshll.u32 %s89_s11, 4  ;;  %v23_v2 = vmax.f32 %v21_v0, 0.0  ;;  %v24_v3 = vmax.f32 %v22_v1, 0.0  ;;  %s34_s12 = int_to_ptr.vmem [resolvable:$true] %s33_s12 }
   0xf   :  { %s64_s13 = scalar_lea.vmem %s34_s12, 256  ;;  %p69_p6 = scmp.lt.s32.totalorder %s34_s12, %s34_s12 }
  0x10   :  { %25 = vst [vmem:[#allocation5] sm:$0xff] %v23_v2  ;;  %26 = vst [vmem:[#allocation5 + $0x8] sm:$0xff] %v24_v3  ;;  %p65_p5 = scmp.ne.s32.totalorder %s34_s12, %s64_s13  ;;  %p70_p7 = scmp.lt.s32.totalorder %s64_s13, %s64_s13 }
  0x12   :  { %p71_p8 = por %p70_p7, %p69_p6 }
  0x14   :  { %p72_p9 = pnand %p71_p8, %p65_p5 }
  0x16   :  { %75 = shalt.err (!%p72_p9)
}
  0x17   :  { %36 = dma.vmem_to_hbm [thread:$0]  %s34_s12, 256, %s107_s1, [#allocation4]  }
  0x18   :  { %86 = dma.done.wait [#allocation4], 256  }
  0x19   :  { %87 = vsyncadd [#allocation4], 4294967040 }
  0x1a   :  { %40 = vsyncpa [#allocation3], 1 }
  0x1b   :  { %41 = vsyncpa [#allocation4], 1 }

</bundles_post_ra>
